<compile_context>
chip_gen: v5e
topology: v5e:2x2
jax: 0.10.0
libtpu: 0.0.40
codegen_flags: <defaults>
</compile_context>

<pallas_src>
import functools

import numpy as np
import jax
import jax.numpy as jnp
from jax.experimental import pallas as pl
from jax.experimental.pallas import tpu as pltpu

QDIM = 4
HIDDEN = [32, 32, 32]
BIAS = 1.0
TILE_N = 1024  # rows (lanes) per grid step; multiple of 128


@functools.lru_cache(maxsize=None)
def _constant_matrices(q):
    """0/1 matrices expressing the L scatter and M = L L^T as 2-D matmuls (numpy)."""
    qq = q * q
    ntril = q * (q + 1) // 2
    # S: (ntril, q*q) scatters L_params -> flattened L (diag first, then strict lower)
    S = np.zeros((ntril, qq), np.float32)
    for d in range(q):
        S[d, d * q + d] = 1.0
    ii, jj = np.tril_indices(q, k=-1)
    for idx, (i, j) in enumerate(zip(ii, jj)):
        S[q + idx, i * q + j] = 1.0
    # dvec: constant +bias on the diagonal positions of flattened L
    dvec = np.zeros((1, qq), np.float32)
    for d in range(q):
        dvec[0, d * q + d] = BIAS
    # M[n,i,j] = sum_k L[n,i,k] * L[n,j,k]
    #   a1 = Lf @ E1  -> a1[n,(i*q+j)*q+k] = Lf[n, i*q+k]
    #   a2 = Lf @ E2  -> a2[n,(i*q+j)*q+k] = Lf[n, j*q+k]
    #   Mf = (a1*a2) @ R   (R sums over k)
    E1 = np.zeros((qq, qq * q), np.float32)
    E2 = np.zeros((qq, qq * q), np.float32)
    R = np.zeros((qq * q, qq), np.float32)
    for i in range(q):
        for j in range(q):
            for k in range(q):
                col = (i * q + j) * q + k
                E1[i * q + k, col] = 1.0
                E2[j * q + k, col] = 1.0
                R[col, i * q + j] = 1.0
    return S, dvec, E1, E2, R


def init_params(key, qdim, hidden):
    """Deterministic torch.nn.Linear-style init (uniform +-1/sqrt(fan_in)).
    Weights stored as (in, out)."""
    sizes = [qdim] + hidden  # LNMLP: qdim -> 32 -> 32 -> 32
    ntril = qdim * (qdim + 1) // 2
    params = []
    dims = list(zip(sizes[:-1], sizes[1:])) + [(hidden[-1], ntril)]
    for (fan_in, fan_out) in dims:
        key, kw, kb = jax.random.split(key, 3)
        bound = 1.0 / np.sqrt(fan_in)
        W = jax.random.uniform(kw, (fan_in, fan_out), jnp.float32, -bound, bound)
        b = jax.random.uniform(kb, (1, fan_out), jnp.float32, -bound, bound)
        params += [W, b]
    return params  # [W1,b1,W2,b2,W3,b3,Wout,bout]


def fold_params(params, qdim):
    """Fold the linear tail (W3, Wo) with the constant scatter/gather matrices.

    Kernel then computes (all transposed, rows on the lane axis):
        h1 = tanh(W1^T x^T + b1^T); h2 = tanh(W2^T h1 + b2^T)
        a  = WA^T h2 + c^T                  # (2*q^3, N): [a1 ; a2]
        Mf^T = R^T (a1 * a2)                # (q*q, N)
    """
    W1, b1, W2, b2, W3, b3, Wo, bo = params
    S, dvec, E1, E2, R = (jnp.asarray(m) for m in _constant_matrices(qdim))
    WL = W3 @ Wo @ S                          # (32, q*q)
    cL = (b3 @ Wo + bo) @ S + dvec            # (1, q*q)
    WA = jnp.concatenate([WL @ E1, WL @ E2], axis=1)   # (32, 2*q^3)
    c = jnp.concatenate([cL @ E1, cL @ E2], axis=1)    # (1, 2*q^3)
    return dict(
        w1t=W1.T,        # (32, qdim)
        b1t=b1.T,        # (32, 1)
        w2t=W2.T,        # (32, 32)
        b2t=b2.T,        # (32, 1)
        wat=WA.T,        # (2*q^3, 32)
        ct=c.T,          # (2*q^3, 1)
        rt=R.T,          # (q*q, q^3)
    )


def cholesky_mm_kernel(xt_ref, w1t_ref, b1t_ref, w2t_ref, b2t_ref,
                       wat_ref, ct_ref, rt_ref, out_ref):
    x = xt_ref[...]                                             # (qdim, T)
    h = jnp.tanh(jnp.dot(w1t_ref[...], x,
                         preferred_element_type=jnp.float32) + b1t_ref[...])
    h = jnp.tanh(jnp.dot(w2t_ref[...], h,
                         preferred_element_type=jnp.float32) + b2t_ref[...])
    a = jnp.dot(wat_ref[...], h,
                preferred_element_type=jnp.float32) + ct_ref[...]   # (2*q^3, T)
    half = a.shape[0] // 2                                      # q^3; multiple of 8 (qdim=4)
    prod = a[:half, :] * a[half:, :]                            # (q^3, T)
    out_ref[...] = jnp.dot(rt_ref[...], prod,
                           preferred_element_type=jnp.float32)  # (q*q, T)


def cholesky_mm_forward(q, folded):
    """q: (..., qdim) float32 -> M: (..., qdim, qdim) float32."""
    qdim = q.shape[-1]
    qq = qdim * qdim
    batch_shape = q.shape[:-1]
    n = int(np.prod(batch_shape)) if batch_shape else 1

    # Lane-dense layout: rows on the 128-lane axis, features on sublanes.
    x = q.reshape(n, qdim).astype(jnp.float32)
    xt = x.T                                                    # (qdim, n)

    # Tile size: big enough to amortize per-step overhead, shrunk for tiny inputs.
    tile = min(TILE_N, max(128, ((n + 127) // 128) * 128))
    n_pad = ((n + tile - 1) // tile) * tile
    xt = jnp.pad(xt, ((0, 0), (0, n_pad - n)))

    ops = [folded[k] for k in ("w1t", "b1t", "w2t", "b2t", "wat", "ct", "rt")]
    full = lambda a: pl.BlockSpec(a.shape, lambda i: (0, 0))

    mt = pl.pallas_call(
        cholesky_mm_kernel,
        out_shape=jax.ShapeDtypeStruct((qq, n_pad), jnp.float32),
        grid_spec=pltpu.PrefetchScalarGridSpec(
            num_scalar_prefetch=0,
            grid=(n_pad // tile,),
            in_specs=[pl.BlockSpec((qdim, tile), lambda i: (0, i))]
                     + [full(a) for a in ops],
            out_specs=pl.BlockSpec((qq, tile), lambda i: (0, i)),
        ),
        compiler_params=pltpu.CompilerParams(
            dimension_semantics=("parallel",),
            vmem_limit_bytes=32 * 1024 * 1024,
        ),
    )(xt, *ops)

    m = mt.T[:n]                                                # (n, q*q), row-major i*q+j
    return m.reshape(*batch_shape, qdim, qdim)


def ref_forward(q, params):
    """Pure-JAX reference mirroring the PyTorch forward (layer by layer)."""
    W1, b1, W2, b2, W3, b3, Wo, bo = params
    qdim = q.shape[-1]
    dot = functools.partial(jnp.matmul, precision=jax.lax.Precision.HIGHEST)
    h = jnp.tanh(dot(q, W1) + b1[0])
    h = jnp.tanh(dot(h, W2) + b2[0])
    h = dot(h, W3) + b3[0]
    p = dot(h, Wo) + bo[0]
    L_diag = p[..., :qdim] + BIAS          # pos_enforce = identity
    L_tril = p[..., qdim:]
    L = jnp.zeros(q.shape[:-1] + (qdim, qdim), jnp.float32)
    ii, jj = np.tril_indices(qdim, k=-1)
    L = L.at[..., ii, jj].set(L_tril)
    di = np.arange(qdim)
    L = L.at[..., di, di].set(L_diag)
    return dot(L, jnp.swapaxes(L, -1, -2))


if __name__ == "__main__":
    key = jax.random.PRNGKey(0)
    kq, kp = jax.random.split(key)
    params = init_params(kp, QDIM, HIDDEN)
    folded = fold_params(params, QDIM)       # done once, reused every call

    # q: (batch=2, seq=8, qdim=4)
    q = jax.random.normal(kq, (2, 8, QDIM), jnp.float32)

    M = cholesky_mm_forward(q, folded)
    M = jax.block_until_ready(M)

    M_ref = ref_forward(q, params)
    assert M.shape == (2, 8, QDIM, QDIM)
    np.testing.assert_allclose(np.asarray(M), np.asarray(M_ref), rtol=1e-4, atol=1e-4)

    print("KERNEL_OK")
</pallas_src>

<mosaic_0001>
module attributes {stable_mosaic.version = 11 : i64} {
  func.func @cholesky_mm_kernel(%arg0: i32, %arg1: memref<4x128xf32, #tpu.memory_space<vmem>>, %arg2: memref<32x4xf32, #tpu.memory_space<vmem>>, %arg3: memref<32x1xf32, #tpu.memory_space<vmem>>, %arg4: memref<32x32xf32, #tpu.memory_space<vmem>>, %arg5: memref<32x1xf32, #tpu.memory_space<vmem>>, %arg6: memref<128x32xf32, #tpu.memory_space<vmem>>, %arg7: memref<128x1xf32, #tpu.memory_space<vmem>>, %arg8: memref<16x64xf32, #tpu.memory_space<vmem>>, %arg9: memref<16x128xf32, #tpu.memory_space<vmem>>) attributes {dimension_semantics = [#tpu.dimension_semantics<parallel>], iteration_bounds = array<i64: 1>, scalar_prefetch = 0 : i64, scratch_operands = 0 : i64, tpu.core_type = #tpu.core_type<tc>, window_params = [{transform_indices = @transform_0, window_bounds = array<i64: 4, 128>}, {pipeline_mode = #tpu.pipeline_mode<synchronous>, transform_indices = @transform_1, window_bounds = array<i64: 32, 4>}, {pipeline_mode = #tpu.pipeline_mode<synchronous>, transform_indices = @transform_2, window_bounds = array<i64: 32, 1>}, {pipeline_mode = #tpu.pipeline_mode<synchronous>, transform_indices = @transform_3, window_bounds = array<i64: 32, 32>}, {pipeline_mode = #tpu.pipeline_mode<synchronous>, transform_indices = @transform_4, window_bounds = array<i64: 32, 1>}, {pipeline_mode = #tpu.pipeline_mode<synchronous>, transform_indices = @transform_5, window_bounds = array<i64: 128, 32>}, {pipeline_mode = #tpu.pipeline_mode<synchronous>, transform_indices = @transform_6, window_bounds = array<i64: 128, 1>}, {pipeline_mode = #tpu.pipeline_mode<synchronous>, transform_indices = @transform_7, window_bounds = array<i64: 16, 64>}, {transform_indices = @transform_8, window_bounds = array<i64: 16, 128>}]} {
    %c0 = arith.constant 0 : index
    %c0_0 = arith.constant 0 : index
    %0 = vector.load %arg1[%c0, %c0_0] : memref<4x128xf32, #tpu.memory_space<vmem>>, vector<4x128xf32>
    %c0_1 = arith.constant 0 : index
    %c0_2 = arith.constant 0 : index
    %1 = vector.load %arg2[%c0_1, %c0_2] : memref<32x4xf32, #tpu.memory_space<vmem>>, vector<32x4xf32>
    %cst = arith.constant dense<0.000000e+00> : vector<32x128xf32>
    %2 = tpu.matmul %1, %0, %cst {dimension_numbers = #tpu.dot_dimension_numbers<[1], [0], [0], [1], [0, 0, 1, 1], [], []>} : vector<32x4xf32>, vector<4x128xf32>, vector<32x128xf32> -> vector<32x128xf32>
    %c0_3 = arith.constant 0 : index
    %c0_4 = arith.constant 0 : index
    %3 = vector.load %arg3[%c0_3, %c0_4] : memref<32x1xf32, #tpu.memory_space<vmem>>, vector<32x1xf32>
    %4 = vector.broadcast %3 : vector<32x1xf32> to vector<32x128xf32>
    %5 = arith.addf %2, %4 : vector<32x128xf32>
    %6 = math.tanh %5 : vector<32x128xf32>
    %c0_5 = arith.constant 0 : index
    %c0_6 = arith.constant 0 : index
    %7 = vector.load %arg4[%c0_5, %c0_6] : memref<32x32xf32, #tpu.memory_space<vmem>>, vector<32x32xf32>
    %cst_7 = arith.constant dense<0.000000e+00> : vector<32x128xf32>
    %8 = tpu.matmul %7, %6, %cst_7 {dimension_numbers = #tpu.dot_dimension_numbers<[1], [0], [0], [1], [0, 0, 1, 1], [], []>} : vector<32x32xf32>, vector<32x128xf32>, vector<32x128xf32> -> vector<32x128xf32>
    %c0_8 = arith.constant 0 : index
    %c0_9 = arith.constant 0 : index
    %9 = vector.load %arg5[%c0_8, %c0_9] : memref<32x1xf32, #tpu.memory_space<vmem>>, vector<32x1xf32>
    %10 = vector.broadcast %9 : vector<32x1xf32> to vector<32x128xf32>
    %11 = arith.addf %8, %10 : vector<32x128xf32>
    %12 = math.tanh %11 : vector<32x128xf32>
    %c0_10 = arith.constant 0 : index
    %c0_11 = arith.constant 0 : index
    %13 = vector.load %arg6[%c0_10, %c0_11] : memref<128x32xf32, #tpu.memory_space<vmem>>, vector<128x32xf32>
    %cst_12 = arith.constant dense<0.000000e+00> : vector<128x128xf32>
    %14 = tpu.matmul %13, %12, %cst_12 {dimension_numbers = #tpu.dot_dimension_numbers<[1], [0], [0], [1], [0, 0, 1, 1], [], []>} : vector<128x32xf32>, vector<32x128xf32>, vector<128x128xf32> -> vector<128x128xf32>
    %c0_13 = arith.constant 0 : index
    %c0_14 = arith.constant 0 : index
    %15 = vector.load %arg7[%c0_13, %c0_14] : memref<128x1xf32, #tpu.memory_space<vmem>>, vector<128x1xf32>
    %16 = vector.broadcast %15 : vector<128x1xf32> to vector<128x128xf32>
    %17 = arith.addf %14, %16 : vector<128x128xf32>
    %18 = vector.extract_strided_slice %17 {offsets = [0, 0], sizes = [64, 128], strides = [1, 1]} : vector<128x128xf32> to vector<64x128xf32>
    %19 = vector.extract_strided_slice %17 {offsets = [64, 0], sizes = [64, 128], strides = [1, 1]} : vector<128x128xf32> to vector<64x128xf32>
    %20 = arith.mulf %18, %19 : vector<64x128xf32>
    %c0_15 = arith.constant 0 : index
    %c0_16 = arith.constant 0 : index
    %21 = vector.load %arg8[%c0_15, %c0_16] : memref<16x64xf32, #tpu.memory_space<vmem>>, vector<16x64xf32>
    %cst_17 = arith.constant dense<0.000000e+00> : vector<16x128xf32>
    %22 = tpu.matmul %21, %20, %cst_17 {dimension_numbers = #tpu.dot_dimension_numbers<[1], [0], [0], [1], [0, 0, 1, 1], [], []>} : vector<16x64xf32>, vector<64x128xf32>, vector<16x128xf32> -> vector<16x128xf32>
    %c0_18 = arith.constant 0 : index
    %c0_19 = arith.constant 0 : index
    %23 = vector.load %arg9[%c0_18, %c0_19] : memref<16x128xf32, #tpu.memory_space<vmem>>, vector<16x128xf32>
    tpu.vector_store %arg9[%c0_18, %c0_19], %22 {strides = array<i32>} : memref<16x128xf32, #tpu.memory_space<vmem>>, vector<16x128xf32>,
    return
  }
  func.func @transform_0(%arg0: i32) -> (i32, i32) {
    %c0_i32 = arith.constant 0 : i32
    %c0_i32_0 = arith.constant 0 : i32
    return %c0_i32, %arg0 : i32, i32
  }
  func.func @transform_1(%arg0: i32) -> (i32, i32) {
    %c0_i32 = arith.constant 0 : i32
    %c0_i32_0 = arith.constant 0 : i32
    %c0_i32_1 = arith.constant 0 : i32
    return %c0_i32, %c0_i32_0 : i32, i32
  }
  func.func @transform_2(%arg0: i32) -> (i32, i32) {
    %c0_i32 = arith.constant 0 : i32
    %c0_i32_0 = arith.constant 0 : i32
    %c0_i32_1 = arith.constant 0 : i32
    return %c0_i32, %c0_i32_0 : i32, i32
  }
  func.func @transform_3(%arg0: i32) -> (i32, i32) {
    %c0_i32 = arith.constant 0 : i32
    %c0_i32_0 = arith.constant 0 : i32
    %c0_i32_1 = arith.constant 0 : i32
    return %c0_i32, %c0_i32_0 : i32, i32
  }
  func.func @transform_4(%arg0: i32) -> (i32, i32) {
    %c0_i32 = arith.constant 0 : i32
    %c0_i32_0 = arith.constant 0 : i32
    %c0_i32_1 = arith.constant 0 : i32
    return %c0_i32, %c0_i32_0 : i32, i32
  }
  func.func @transform_5(%arg0: i32) -> (i32, i32) {
    %c0_i32 = arith.constant 0 : i32
    %c0_i32_0 = arith.constant 0 : i32
    %c0_i32_1 = arith.constant 0 : i32
    return %c0_i32, %c0_i32_0 : i32, i32
  }
  func.func @transform_6(%arg0: i32) -> (i32, i32) {
    %c0_i32 = arith.constant 0 : i32
    %c0_i32_0 = arith.constant 0 : i32
    %c0_i32_1 = arith.constant 0 : i32
    return %c0_i32, %c0_i32_0 : i32, i32
  }
  func.func @transform_7(%arg0: i32) -> (i32, i32) {
    %c0_i32 = arith.constant 0 : i32
    %c0_i32_0 = arith.constant 0 : i32
    %c0_i32_1 = arith.constant 0 : i32
    return %c0_i32, %c0_i32_0 : i32, i32
  }
  func.func @transform_8(%arg0: i32) -> (i32, i32) {
    %c0_i32 = arith.constant 0 : i32
    %c0_i32_0 = arith.constant 0 : i32
    return %c0_i32, %arg0 : i32, i32
  }
}

</mosaic_0001>

<bundles_post_ra>
// kernel: tpu_custom_call.1
= control target key start
LH: loop header
LB: loop body
LE: loop exit
PB: predicated region body
PF: predicated region fallthrough
CT: control target
= control target key end

     0   :  { %vm72_vm0 = vcmask 1043456   ;;  %v553_v3 = vmov 0   ;;  %vm59_vm1 = vcmask 31744   ;;  %s782_s0 = inlined_call_operand.vmem [shape: f32[4,128], index: 0, kind: input, shape index: {}]   ;;  %s783_s1 = inlined_call_operand.vmem [shape: f32[32,4], index: 1, kind: input, shape index: {}]   ;;  %s784_s2 = inlined_call_operand.vmem [shape: f32[32,1], index: 2, kind: input, shape index: {}]   ;;  %s785_s3 = inlined_call_operand.vmem [shape: f32[32,32], index: 3, kind: input, shape index: {}]   ;;  %s786_s4 = inlined_call_operand.vmem [shape: f32[32,1], index: 4, kind: input, shape index: {}]   ;;  %s787_s5 = inlined_call_operand.vmem [shape: f32[128,32], index: 5, kind: input, shape index: {}]   ;;  %s788_s6 = inlined_call_operand.vmem [shape: f32[128,1], index: 6, kind: input, shape index: {}]   ;;  %s789_s7 = inlined_call_operand.vmem [shape: f32[16,64], index: 7, kind: input, shape index: {}]   ;;  %s790_s8 = inlined_call_operand.hbm [shape: f32[16,128], index: 8, kind: output, shape index: {}]  }
   0x1   :  { %v30_v0 = vld [vmem:[%s782_s0] sm:$0xf]  ;;  %v38_v1 = vld [vmem:[%s784_s2 + $0x18] sm:$0xff]  ;;  %v36_v2 = vld [vmem:[%s784_s2 + $0x8] sm:$0xff]  ;;  %509 = vset.pattern.permute.xlu1 %v553_v3  ;;  %508 = vset.pattern.permute.xlu0 %v553_v3 }
   0x2   :  { %v32_v4 = vld [vmem:[%s783_s1 + $0x8] sm:$0xff]  ;;  %495 = vmatpush.msk.msra.mxu1 %vm72_vm0, %v30_v0  ;;  %56 = vperm.xlu0 %508, %v38_v1   ;;  %v31_v5 = vld [vmem:[%s783_s1] sm:$0xff] }
   0x3   :  { %46 = vperm.xlu1 %509, %v36_v2   ;;  %470 = vmatmul.msk.f32.vlgmr.msra.gmra.mxu1 %vm59_vm1, %v32_v4 }
   0x4   :  { %468 = vmatpush.msk.msra.mxu0 %vm72_vm0, %v30_v0  ;;  %510 = vset.pattern.permute.xlu2 %v553_v3 }
   0x5   :  { %469 = vmatmul.msk.f32.vlgmr.msra.gmra.mxu0 %vm59_vm1, %v31_v5 }
   0x6   :  { %13 = vsyncpa [#allocation3], 0  ;;  %v37_v6 = vld [vmem:[%s784_s2 + $0x10] sm:$0xff]  ;;  %v35_v7 = vld [vmem:[%s784_s2] sm:$0xff]  ;;  %vm137_vm2 = vcmask 261120   ;;  %vm418_vm3 = vcmask 523264  }
   0x7   :  { %v33_v8 = vld [vmem:[%s783_s1 + $0x10] sm:$0xff]  ;;  %v114_v9 = vld [vmem:[%s786_s4 + $0x8] sm:$0xff]  ;;  %v113_v10 = vld [vmem:[%s786_s4] sm:$0xff]  ;;  %s554_s24 = smov [#allocation2]   ;;  %s456_s27 = sshll.u32 %s790_s8, 4  ;;  %s457_s27 = int_to_ptr.hbm [resolvable:$true] %s456_s27 }
   0x8   :  { %v34_v11 = vld [vmem:[%s783_s1 + $0x18] sm:$0xff]  ;;  %v205_v13 = vld [vmem:[%s788_s6 + $0x30] sm:$0xff]  ;;  %v204_v14 = vld [vmem:[%s788_s6 + $0x28] sm:$0xff]  ;;  %s454_s25 = sshll.u32 %s554_s24, 4  ;;  %s556_s28 = smov 8   ;;  %s455_s25 = int_to_ptr.vmem [resolvable:$true] %s454_s25 }
   0x9   :  { %v214_v12 = vld [vmem:[%s788_s6 + $0x78] sm:$0xff]  ;;  %v212_v15 = vld [vmem:[%s788_s6 + $0x68] sm:$0xff]  ;;  %v211_v16 = vld [vmem:[%s788_s6 + $0x60] sm:$0xff] }
   0xa   :  { %51 = vperm.xlu0 %508, %v37_v6   ;;  %v202_v17 = vld [vmem:[%s788_s6 + $0x18] sm:$0xff]  ;;  %v201_v18 = vld [vmem:[%s788_s6 + $0x10] sm:$0xff]  ;;  %v208_v20 = vld [vmem:[%s788_s6 + $0x48] sm:$0xff] }
   0xb   :  { %41 = vperm.xlu1 %509, %v35_v7   ;;  %471 = vmatmul.msk.f32.gmra.mxu1 %vm59_vm1, %v33_v8  ;;  %v209_v19 = vld [vmem:[%s788_s6 + $0x50] sm:$0xff]  ;;  %v199_v21 = vld [vmem:[%s788_s6] sm:$0xff]  ;;  %v116_v22 = vld [vmem:[%s786_s4 + $0x18] sm:$0xff] }
   0xc   :  { %134 = vperm.xlu2 %510, %v116_v22   ;;  %v115_v24 = vld [vmem:[%s786_s4 + $0x10] sm:$0xff]  ;;  %v206_v28 = vld [vmem:[%s788_s6 + $0x38] sm:$0xff]  ;;  %v203_v40 = vld [vmem:[%s788_s6 + $0x20] sm:$0xff]  ;;  %s555_s4 = smov 128  }
   0xd   :  { %v213_v35 = vld [vmem:[%s788_s6 + $0x70] sm:$0xff]  ;;  %v109_v42 = vld [vmem:[%s785_s3] sm:$0xff]  ;;  %v210_v44 = vld [vmem:[%s788_s6 + $0x58] sm:$0xff] }
   0xe   :  { %v110_v45 = vld [vmem:[%s785_s3 + $0x8] sm:$0xff]  ;;  %v111_v47 = vld [vmem:[%s785_s3 + $0x10] sm:$0xff]  ;;  %v207_v48 = vld [vmem:[%s788_s6 + $0x40] sm:$0xff] }
   0xf   :  { %v200_v46 = vld [vmem:[%s788_s6 + $0x8] sm:$0xff]  ;;  %v112_v49 = vld [vmem:[%s785_s3 + $0x18] sm:$0xff]  ;;  %v183_v1 = vld [vmem:[%s787_s5] sm:$0xff] }
  0x10   :  { %v187_v3 = vld [vmem:[%s787_s5 + $0x20] sm:$0xff]  ;;  %v194_v4 = vld [vmem:[%s787_s5 + $0x58] sm:$0xff]  ;;  %v184_v5 = vld [vmem:[%s787_s5 + $0x8] sm:$0xff] }
  0x11   :  { %v188_v6 = vld [vmem:[%s787_s5 + $0x28] sm:$0xff]  ;;  %v195_v7 = vld [vmem:[%s787_s5 + $0x60] sm:$0xff]  ;;  %v185_v8 = vld [vmem:[%s787_s5 + $0x10] sm:$0xff] }
  0x12   :  { %124 = vperm.xlu0 %508, %v114_v9   ;;  %v189_v9 = vld [vmem:[%s787_s5 + $0x30] sm:$0xff] }
  0x13   :  { %119 = vperm.xlu1 %509, %v113_v10   ;;  %472 = vmatmul.msk.f32.gmra.mxu1 %vm59_vm1, %v34_v11  ;;  %v196_v10 = vld [vmem:[%s787_s5 + $0x68] sm:$0xff]  ;;  %v186_v11 = vld [vmem:[%s787_s5 + $0x18] sm:$0xff] }
  0x14   :  { %129 = vperm.xlu2 %510, %v115_v24  }
  0x1a   :  { %292 = vperm.xlu0 %508, %v214_v12   ;;  %v190_v12 = vld [vmem:[%s787_s5 + $0x38] sm:$0xff] }
  0x1b   :  { %247 = vperm.xlu1 %509, %v205_v13   ;;  %v197_v13 = vld [vmem:[%s787_s5 + $0x70] sm:$0xff] }
  0x1c   :  { %252 = vperm.xlu2 %510, %v206_v28  }
  0x22   :  { %242 = vperm.xlu0 %508, %v204_v14   ;;  %v191_v14 = vld [vmem:[%s787_s5 + $0x40] sm:$0xff] }
  0x23   :  { %282 = vperm.xlu1 %509, %v212_v15   ;;  %v198_v15 = vld [vmem:[%s787_s5 + $0x78] sm:$0xff] }
  0x24   :  { %287 = vperm.xlu2 %510, %v213_v35  }
  0x2a   :  { %277 = vperm.xlu0 %508, %v211_v16   ;;  %v192_v16 = vld [vmem:[%s787_s5 + $0x48] sm:$0xff] }
  0x2b   :  { %232 = vperm.xlu1 %509, %v202_v17   ;;  %v193_v17 = vld [vmem:[%s787_s5 + $0x50] sm:$0xff] }
  0x2c   :  { %237 = vperm.xlu2 %510, %v203_v40  }
  0x32   :  { %227 = vperm.xlu0 %508, %v201_v18  }
  0x33   :  { %267 = vperm.xlu1 %509, %v209_v19  }
  0x34   :  { %272 = vperm.xlu2 %510, %v210_v44  }
  0x3a   :  { %262 = vperm.xlu0 %508, %v208_v20  }
  0x3b   :  { %217 = vperm.xlu1 %509, %v199_v21  }
  0x3c   :  { %222 = vperm.xlu2 %510, %v200_v46  }
  0x44   :  { %257 = vperm.xlu2 %510, %v207_v48  }
  0x66   :  { %v135_v52 = vpop.permute.xlu2 %134 }
  0x6e   :  { %v130_v54 = vpop.permute.xlu2 %129 }
  0x74   :  { %v57_v25 = vpop.permute.xlu0 %56 }
  0x75   :  { %v47_v27 = vpop.permute.xlu1 %46 }
  0x76   :  { %v253_v18 = vpop.permute.xlu2 %252 }
  0x7c   :  { %v52_v29 = vpop.permute.xlu0 %51 }
  0x7d   :  { %v42_v36 = vpop.permute.xlu1 %41 }
  0x80   :  { %v96_v23 = vpop.f32.mrf.mxu1 }
  0x81   :  { %v97_v34 = vadd.f32 %v96_v23, %v47_v27 }
  0x82   :  { %v93_v33 = vpop.f32.mrf.mxu0 }
  0x83   :  { %v94_v37 = vadd.f32 %v93_v33, %v42_v36 }
  0x84   :  { %v125_v58 = vpop.permute.xlu0 %124 }
  0x85   :  { %v120_v60 = vpop.permute.xlu1 %119 }
  0x88   :  { %v99_v26 = vpop.f32.mrf.mxu1 }
  0x89   :  { %v100_v31 = vadd.f32 %v99_v26, %v52_v29 }
  0x8c   :  { %v293_v22 = vpop.permute.xlu0 %292 }
  0x8d   :  { %v248_v26 = vpop.permute.xlu1 %247 }
  0x90   :  { %v102_v30 = vpop.f32.mrf.mxu1 }
  0x91   :  { %v103_v32 = vadd.f32 %v102_v30, %v57_v25  ;;  %v288_v25 = vpop.permute.xlu2 %287 }
  0x93   :  { %511 = vtanh.f32 %v103_v32 }
  0x94   :  { %513 = vtanh.f32 %v100_v31  ;;  %v243_v30 = vpop.permute.xlu0 %242 }
  0x95   :  { %515 = vtanh.f32 %v97_v34  ;;  %v283_v32 = vpop.permute.xlu1 %282 }
  0x96   :  { %517 = vtanh.f32 %v94_v37 }
  0x99   :  { %v512_v38 = vpop.eup %511  ;;  %v238_v31 = vpop.permute.xlu2 %237 }
  0x9a   :  { %162 = vmatpush.msrb.mxu1 %v512_v38  ;;  %v514_v39 = vpop.eup %513 }
  0x9b   :  { %v516_v41 = vpop.eup %515 }
  0x9c   :  { %163 = vmatpush.msrb.mxu1 %v514_v39  ;;  %v518_v43 = vpop.eup %517  ;;  %v278_v36 = vpop.permute.xlu0 %277 }
  0x9d   :  { %v233_v38 = vpop.permute.xlu1 %232 }
  0x9e   :  { %164 = vmatpush.msrb.mxu1 %v516_v41 }
  0xa0   :  { %165 = vmatpush.msrb.mxu1 %v518_v43 }
  0xa1   :  { %473 = vmatmul.msk.f32.vlgmr.msrb.gmra.mxu1 %vm137_vm2, %v109_v42  ;;  %v273_v37 = vpop.permute.xlu2 %272 }
  0xa9   :  { %474 = vmatmul.msk.f32.gmra.mxu1 %vm137_vm2, %v110_v45 }
  0xb1   :  { %475 = vmatmul.msk.f32.gmra.mxu1 %vm137_vm2, %v111_v47 }
  0xb9   :  { %476 = vmatmul.msk.f32.gmra.mxu1 %vm137_vm2, %v112_v49 }
 0x11e   :  { %v167_v50 = vpop.f32.mrf.mxu1 }
 0x11f   :  { %v168_v61 = vadd.f32 %v167_v50, %v120_v60 }
 0x126   :  { %v170_v51 = vpop.f32.mrf.mxu1 }
 0x127   :  { %v171_v59 = vadd.f32 %v170_v51, %v125_v58  ;;  %v228_v51 = vpop.permute.xlu0 %227 }
 0x12e   :  { %v173_v53 = vpop.f32.mrf.mxu1 }
 0x12f   :  { %v174_v56 = vadd.f32 %v173_v53, %v130_v54 }
 0x136   :  { %v176_v55 = vpop.f32.mrf.mxu1 }
 0x137   :  { %v177_v57 = vadd.f32 %v176_v55, %v135_v52  ;;  %v223_v55 = vpop.permute.xlu2 %222 }
 0x139   :  { %519 = vtanh.f32 %v177_v57 }
 0x13a   :  { %521 = vtanh.f32 %v174_v56 }
 0x13b   :  { %523 = vtanh.f32 %v171_v59  ;;  %v268_v59 = vpop.permute.xlu1 %267 }
 0x13c   :  { %525 = vtanh.f32 %v168_v61  ;;  %v263_v61 = vpop.permute.xlu0 %262 }
 0x13f   :  { %v520_v62 = vpop.eup %519 }
 0x140   :  { %355 = vmatpush.msrb.mxu0 %v520_v62  ;;  %496 = vmatpush.msra.mxu2 %v520_v62  ;;  %v522_v63 = vpop.eup %521 }
 0x141   :  { %497 = vmatpush.msra.mxu3 %v520_v62  ;;  %v524_v0 = vpop.eup %523 }
 0x142   :  { %356 = vmatpush.msrb.mxu0 %v522_v63  ;;  %498 = vmatpush.msra.mxu2 %v522_v63  ;;  %v526_v2 = vpop.eup %525 }
 0x143   :  { %499 = vmatpush.msra.mxu3 %v522_v63 }
 0x144   :  { %357 = vmatpush.msrb.mxu0 %v524_v0  ;;  %500 = vmatpush.msra.mxu2 %v524_v0 }
 0x145   :  { %501 = vmatpush.msra.mxu3 %v524_v0 }
 0x146   :  { %358 = vmatpush.msrb.mxu0 %v526_v2  ;;  %502 = vmatpush.msra.mxu2 %v526_v2 }
 0x147   :  { %503 = vmatpush.msra.mxu3 %v526_v2  ;;  %477 = vmatmul.msk.f32.vlgmr.msrb.gmra.mxu0 %vm137_vm2, %v183_v1  ;;  %v258_v2 = vpop.permute.xlu2 %257 }
 0x148   :  { %481 = vmatmul.msk.f32.vlgmr.msra.gmra.mxu2 %vm137_vm2, %v187_v3  ;;  %488 = vmatmul.msk.f32.vlgmr.msra.gmra.mxu3 %vm137_vm2, %v194_v4 }
 0x14f   :  { %478 = vmatmul.msk.f32.gmra.mxu0 %vm137_vm2, %v184_v5 }
 0x150   :  { %482 = vmatmul.msk.f32.gmra.mxu2 %vm137_vm2, %v188_v6  ;;  %489 = vmatmul.msk.f32.gmra.mxu3 %vm137_vm2, %v195_v7  ;;  %v218_v6 = vpop.permute.xlu1 %217 }
 0x157   :  { %479 = vmatmul.msk.f32.gmra.mxu0 %vm137_vm2, %v185_v8 }
 0x158   :  { %483 = vmatmul.msk.f32.gmra.mxu2 %vm137_vm2, %v189_v9  ;;  %490 = vmatmul.msk.f32.gmra.mxu3 %vm137_vm2, %v196_v10  ;;  %v416_v10 = vld [vmem:[%s789_s7] sm:$0xff] }
 0x15f   :  { %480 = vmatmul.msk.f32.gmra.mxu0 %vm137_vm2, %v186_v11  ;;  %v417_v11 = vld [vmem:[%s789_s7 + $0x8] sm:$0xff] }
 0x160   :  { %484 = vmatmul.msk.f32.gmra.mxu2 %vm137_vm2, %v190_v12  ;;  %491 = vmatmul.msk.f32.gmra.mxu3 %vm137_vm2, %v197_v13 }
 0x168   :  { %485 = vmatmul.msk.f32.gmra.mxu2 %vm137_vm2, %v191_v14  ;;  %492 = vmatmul.msk.f32.gmra.mxu3 %vm137_vm2, %v198_v15 }
 0x170   :  { %486 = vmatmul.msk.f32.gmra.mxu2 %vm137_vm2, %v192_v16 }
 0x178   :  { %487 = vmatmul.msk.f32.gmra.mxu2 %vm137_vm2, %v193_v17 }
 0x1c4   :  { %v360_v21 = vpop.f32.mrf.mxu0 }
 0x1c5   :  { %v361_v7 = vadd.f32 %v360_v21, %v218_v6 }
 0x1cb   :  { %v372_v19 = vpop.f32.mrf.mxu2  ;;  %v393_v20 = vpop.f32.mrf.mxu3 }
 0x1cc   :  { %v363_v27 = vpop.f32.mrf.mxu0  ;;  %v373_v52 = vadd.f32 %v372_v19, %v238_v31  ;;  %v394_v57 = vadd.f32 %v393_v20, %v273_v37 }
 0x1cd   :  { %v364_v3 = vadd.f32 %v363_v27, %v223_v55 }
 0x1d3   :  { %v375_v23 = vpop.f32.mrf.mxu2  ;;  %v396_v24 = vpop.f32.mrf.mxu3 }
 0x1d4   :  { %v366_v35 = vpop.f32.mrf.mxu0  ;;  %v376_v48 = vadd.f32 %v375_v23, %v243_v30  ;;  %v397_v49 = vadd.f32 %v396_v24, %v278_v36 }
 0x1d5   :  { %v367_v63 = vadd.f32 %v366_v35, %v228_v51 }
 0x1d6   :  { %v412_v58 = vmul.f32 %v397_v49, %v373_v52 }
 0x1db   :  { %v378_v28 = vpop.f32.mrf.mxu2  ;;  %v399_v29 = vpop.f32.mrf.mxu3 }
 0x1dc   :  { %v379_v44 = vadd.f32 %v378_v28, %v248_v26  ;;  %v400_v45 = vadd.f32 %v399_v29, %v283_v32  ;;  %v369_v47 = vpop.f32.mrf.mxu0 }
 0x1dd   :  { %v370_v53 = vadd.f32 %v369_v47, %v233_v38 }
 0x1de   :  { %v413_v54 = vmul.f32 %v400_v45, %v376_v48 }
 0x1df   :  { %v411_v60 = vmul.f32 %v394_v57, %v370_v53 }
 0x1e3   :  { %v381_v33 = vpop.f32.mrf.mxu2  ;;  %v402_v34 = vpop.f32.mrf.mxu3 }
 0x1e4   :  { %v382_v41 = vadd.f32 %v381_v33, %v253_v18  ;;  %v403_v42 = vadd.f32 %v402_v34, %v288_v25 }
 0x1e6   :  { %v414_v50 = vmul.f32 %v403_v42, %v379_v44 }
 0x1eb   :  { %v384_v39 = vpop.f32.mrf.mxu2  ;;  %v405_v40 = vpop.f32.mrf.mxu3 }
 0x1ec   :  { %v406_v43 = vadd.f32 %v405_v40, %v293_v22  ;;  %v385_v4 = vadd.f32 %v384_v39, %v258_v2 }
 0x1ee   :  { %v415_v46 = vmul.f32 %v406_v43, %v382_v41  ;;  %v408_v9 = vmul.f32 %v385_v4, %v361_v7 }
 0x1f0   :  { %433 = vmatpush.msrb.mxu3 %v415_v46 }
 0x1f2   :  { %434 = vmatpush.msrb.mxu3 %v414_v50 }
 0x1f3   :  { %v387_v56 = vpop.f32.mrf.mxu2 }
 0x1f4   :  { %435 = vmatpush.msrb.mxu3 %v413_v54  ;;  %v388_v0 = vadd.f32 %v387_v56, %v263_v61 }
 0x1f6   :  { %436 = vmatpush.msrb.mxu3 %v412_v58  ;;  %v409_v8 = vmul.f32 %v388_v0, %v364_v3 }
 0x1f8   :  { %437 = vmatpush.msrb.mxu3 %v411_v60 }
 0x1fb   :  { %v390_v62 = vpop.f32.mrf.mxu2 }
 0x1fc   :  { %v391_v1 = vadd.f32 %v390_v62, %v268_v59 }
 0x1fe   :  { %v410_v5 = vmul.f32 %v391_v1, %v367_v63 }
 0x200   :  { %438 = vmatpush.msrb.mxu3 %v410_v5 }
 0x202   :  { %439 = vmatpush.msrb.mxu3 %v409_v8 }
 0x204   :  { %440 = vmatpush.msrb.mxu3 %v408_v9 }
 0x205   :  { %493 = vmatmul.msk.f32.vlgmr.msrb.gmra.mxu3 %vm418_vm3, %v416_v10 }
 0x20d   :  { %494 = vmatmul.msk.f32.gmra.mxu3 %vm418_vm3, %v417_v11 }
 0x288   :  { %v442_v12 = vpop.f32.mrf.mxu3 }
 0x289   :  { %448 = vst [vmem:[#allocation2] sm:$0xff] %v442_v12 }
 0x290   :  { %v445_v13 = vpop.f32.mrf.mxu3 }
 0x291   :  { %449 = vst [vmem:[#allocation2 + $0x8] sm:$0xff] %v445_v13 }
 0x292   :  { %462 = dma.vmem_to_hbm [thread:$0]  %s455_s25, 256, %s457_s27, [#allocation3], %s555_s4, %s555_s4, %s556_s28  }
 0x293   :  { %551 = dma.done.wait [#allocation3], 256  }
 0x294   :  { %552 = vsyncadd [#allocation3], 4294967040 }
 0x295   :  { %467 = vsyncpa [#allocation3], 1 }

</bundles_post_ra>
